<compile_context>
chip_gen: v7x
topology: tpu7x:2x2x1
jax: 0.10.0
libtpu: 0.0.40
codegen_flags: <defaults>
</compile_context>

<pallas_src>
import functools

import jax
import jax.numpy as jnp
from jax.experimental import pallas as pl
from jax.experimental.pallas import tpu as pltpu

_SUBLANES = 8
_LANES = 128
_VREG = _SUBLANES * _LANES  # 1024 elements


def _batchout_resident_kernel(n, r_ref, x_ref, o_ref):
    # x_ref: (B, 8, L) whole array resident in VMEM; o_ref: (1, 8, L) row i.
    i = pl.program_id(0)
    x = x_ref[i].astype(jnp.float32)            # (8, L)
    s = x_ref[r_ref[i]].astype(jnp.float32)     # (8, L) gathered row
    o_ref[0] = (x + n * (s - x)).astype(o_ref.dtype)


def _batchout_stream_kernel(n, r_ref, x_ref, samp_ref, o_ref):
    # r_ref (SMEM scalar-prefetch) is consumed by the index_maps.
    x = x_ref[...].astype(jnp.float32)
    s = samp_ref[...].astype(jnp.float32)
    o_ref[...] = (x + n * (s - x)).astype(o_ref.dtype)


def _pick_lane_tile(total_lanes, itemsize, max_tile_bytes):
    """Largest lane-tile that is a multiple of 128, divides total_lanes and
    keeps an (8, tile) block under max_tile_bytes."""
    max_lanes = max(_LANES,
                    (max_tile_bytes // (_SUBLANES * itemsize)) // _LANES * _LANES)
    tl = min(total_lanes, max_lanes)
    while total_lanes % tl:
        tl -= _LANES
    return tl


def batchout_many(x, r, n, *, max_resident_bytes=6 * 1024 * 1024,
                  max_tile_bytes=2 * 1024 * 1024):
    """x: (B, C, H, W) float, r: (B,) int32 batch indices, n: python scalar."""
    B, C, H, W = x.shape
    F = C * H * W
    itemsize = jnp.dtype(x.dtype).itemsize
    n = float(n)                      # static -> compile-time constant in kernel
    r = r.astype(jnp.int32)

    # Pad the flattened feature dim to a vreg multiple -> (B, 8, L) dense view.
    Fp = -(-F // _VREG) * _VREG
    xf = x.reshape(B, F)
    if Fp != F:
        xf = jnp.pad(xf, ((0, 0), (0, Fp - F)))
    L = Fp // _SUBLANES
    x3 = xf.reshape(B, _SUBLANES, L)

    total_bytes = B * Fp * itemsize

    if total_bytes <= max_resident_bytes:
        # --- resident path: read every element of x from HBM exactly once ---
        kernel = functools.partial(_batchout_resident_kernel, n)
        out3 = pl.pallas_call(
            kernel,
            out_shape=jax.ShapeDtypeStruct((B, _SUBLANES, L), x.dtype),
            grid_spec=pltpu.PrefetchScalarGridSpec(
                num_scalar_prefetch=1,
                grid=(B,),
                in_specs=[
                    # whole x, constant block index -> stays resident in VMEM
                    pl.BlockSpec((B, _SUBLANES, L), lambda i, r_ref: (0, 0, 0)),
                ],
                out_specs=pl.BlockSpec((1, _SUBLANES, L),
                                       lambda i, r_ref: (i, 0, 0)),
            ),
            compiler_params=pltpu.CompilerParams(
                dimension_semantics=("parallel",)),
            cost_estimate=pl.CostEstimate(
                flops=2 * B * Fp, transcendentals=0,
                bytes_accessed=2 * B * Fp * itemsize),
        )(r, x3)
    else:
        # --- streaming path: tile the feature dim, gather via scalar prefetch ---
        TL = _pick_lane_tile(L, itemsize, max_tile_bytes)
        kernel = functools.partial(_batchout_stream_kernel, n)
        out3 = pl.pallas_call(
            kernel,
            out_shape=jax.ShapeDtypeStruct((B, _SUBLANES, L), x.dtype),
            grid_spec=pltpu.PrefetchScalarGridSpec(
                num_scalar_prefetch=1,
                grid=(B, L // TL),
                in_specs=[
                    # x[i]
                    pl.BlockSpec((1, _SUBLANES, TL),
                                 lambda i, j, r_ref: (i, 0, j)),
                    # x[r[i]] (data-dependent gather)
                    pl.BlockSpec((1, _SUBLANES, TL),
                                 lambda i, j, r_ref: (r_ref[i], 0, j)),
                ],
                out_specs=pl.BlockSpec((1, _SUBLANES, TL),
                                       lambda i, j, r_ref: (i, 0, j)),
            ),
            compiler_params=pltpu.CompilerParams(
                dimension_semantics=("parallel", "parallel")),
            cost_estimate=pl.CostEstimate(
                flops=2 * B * Fp, transcendentals=0,
                bytes_accessed=3 * B * Fp * itemsize),
        )(r, x3, x3)

    out = out3.reshape(B, Fp)[:, :F].reshape(B, C, H, W)
    return out, r


def make_random(key, x, y):
    # Mirrors Batchout_Many._make_random: uniform random batch indices.
    # (The PyTorch re-sampling loop body is a no-op bug, so plain uniform
    #  sampling reproduces its effective behavior.)
    del y
    B = x.shape[0]
    return jax.random.randint(key, (B,), 0, B, dtype=jnp.int32)


if __name__ == "__main__":
    key = jax.random.PRNGKey(0)
    kx1, ky1, kr1, kx2, kr2 = jax.random.split(key, 5)

    # --- Test 1: module-sized input (C*H*W = 1024, vreg-aligned) -> resident path.
    B, C, H, W = 2, 4, 16, 16
    n = 0.5
    x = jax.random.normal(kx1, (B, C, H, W), dtype=jnp.float32)
    y = jax.random.randint(ky1, (B,), 0, 10, dtype=jnp.int32)  # labels (only for r gen)
    r = make_random(kr1, x, y)

    out, r_out = batchout_many(x, r, n)
    out = jax.block_until_ready(out)

    ref = x + n * (x[r] - x)
    assert out.shape == x.shape and out.dtype == x.dtype
    assert jnp.allclose(out, ref, atol=1e-6), "mismatch vs reference (resident path)"
    assert jnp.array_equal(r_out, r)

    # --- Test 2: non-aligned shape (needs padding) + forced streaming/tiled path.
    B2, C2, H2, W2 = 2, 8, 18, 18      # F = 2592 -> padded to 3072, L = 384
    n2 = 0.25
    x2 = jax.random.normal(kx2, (B2, C2, H2, W2), dtype=jnp.float32)
    r2 = jax.random.randint(kr2, (B2,), 0, B2, dtype=jnp.int32)
    out2, _ = batchout_many(x2, r2, n2,
                            max_resident_bytes=0,                 # force streaming path
                            max_tile_bytes=_VREG * 4)             # TL=128 -> 3 feature tiles
    out2 = jax.block_until_ready(out2)
    ref2 = x2 + n2 * (x2[r2] - x2)
    assert jnp.allclose(out2, ref2, atol=1e-6), "mismatch vs reference (streaming path)"

    print("KERNEL_OK")
</pallas_src>

<mosaic_0001>
module attributes {stable_mosaic.version = 11 : i64} {
  func.func @_batchout_resident_kernel(%arg0: i32, %arg1: memref<2xi32, #tpu.memory_space<smem>>, %arg2: memref<2x8x128xf32, #tpu.memory_space<vmem>>, %arg3: memref<1x8x128xf32, #tpu.memory_space<vmem>>) attributes {dimension_semantics = [#tpu.dimension_semantics<parallel>], iteration_bounds = array<i64: 2>, scalar_prefetch = 1 : i64, scratch_operands = 0 : i64, tpu.core_type = #tpu.core_type<tc>, window_params = [{pipeline_mode = #tpu.pipeline_mode<synchronous>, transform_indices = @transform_0, window_bounds = array<i64: 2, 8, 128>}, {transform_indices = @transform_1, window_bounds = array<i64: 1, 8, 128>}]} {
    %0 = arith.index_cast %arg0 : i32 to index
    %c0 = arith.constant 0 : index
    %c0_0 = arith.constant 0 : index
    %1 = vector.load %arg2[%0, %c0, %c0_0] : memref<2x8x128xf32, #tpu.memory_space<vmem>>, vector<1x8x128xf32>
    %2 = vector.shape_cast %1 : vector<1x8x128xf32> to vector<8x128xf32>
    %3 = arith.index_cast %arg0 : i32 to index
    %4 = memref.load %arg1[%3] : memref<2xi32, #tpu.memory_space<smem>>
    %5 = arith.index_cast %4 : i32 to index
    %c0_1 = arith.constant 0 : index
    %c0_2 = arith.constant 0 : index
    %6 = vector.load %arg2[%5, %c0_1, %c0_2] : memref<2x8x128xf32, #tpu.memory_space<vmem>>, vector<1x8x128xf32>
    %7 = vector.shape_cast %6 : vector<1x8x128xf32> to vector<8x128xf32>
    %8 = arith.subf %7, %2 : vector<8x128xf32>
    %cst = arith.constant 5.000000e-01 : f32
    %9 = vector.broadcast %cst : f32 to vector<8x128xf32>
    %10 = arith.mulf %9, %8 : vector<8x128xf32>
    %11 = arith.addf %2, %10 : vector<8x128xf32>
    %c0_3 = arith.constant 0 : index
    %c0_4 = arith.constant 0 : index
    %c0_5 = arith.constant 0 : index
    %12 = vector.load %arg3[%c0_3, %c0_4, %c0_5] : memref<1x8x128xf32, #tpu.memory_space<vmem>>, vector<1x8x128xf32>
    %13 = vector.shape_cast %12 : vector<1x8x128xf32> to vector<8x128xf32>
    %14 = vector.shape_cast %11 : vector<8x128xf32> to vector<1x8x128xf32>
    tpu.vector_store %arg3[%c0_3, %c0_4, %c0_5], %14 {strides = array<i32>} : memref<1x8x128xf32, #tpu.memory_space<vmem>>, vector<1x8x128xf32>,
    return
  }
  func.func @transform_0(%arg0: i32, %arg1: memref<2xi32, #tpu.memory_space<smem>>) -> (i32, i32, i32) {
    %c0_i32 = arith.constant 0 : i32
    %c0_i32_0 = arith.constant 0 : i32
    %c0_i32_1 = arith.constant 0 : i32
    %c0_i32_2 = arith.constant 0 : i32
    return %c0_i32, %c0_i32_0, %c0_i32_1 : i32, i32, i32
  }
  func.func @transform_1(%arg0: i32, %arg1: memref<2xi32, #tpu.memory_space<smem>>) -> (i32, i32, i32) {
    %c0_i32 = arith.constant 0 : i32
    %c0_i32_0 = arith.constant 0 : i32
    %c0_i32_1 = arith.constant 0 : i32
    return %arg0, %c0_i32, %c0_i32_0 : i32, i32, i32
  }
}

</mosaic_0001>

<bundles_post_ra>
// kernel: tpu_custom_call.1
= control target key start
LH: loop header
LB: loop body
LE: loop exit
PB: predicated region body
PF: predicated region fallthrough
CT: control target
= control target key end

     0   :  { %s540_s0 = inlined_call_operand.hbm [shape: s32[2], index: 0, kind: input, shape index: {}]   ;;  %s541_s1 = inlined_call_operand.hbm [shape: f32[2,8,128], index: 1, kind: input, shape index: {}]   ;;  %s542_s2 = inlined_call_operand.hbm [shape: f32[2,8,128], index: 2, kind: output, shape index: {}]  }
   0x1   :  { %s268_s11 = scalar_lea.hbm %s540_s0, 16 }
   0x2   :  { %p269_p0 = scmp.ne.s32.totalorder %s540_s0, %s268_s11  ;;  %p272_p1 = scmp.lt.u32.totalorder %s268_s11, %s540_s0 }
   0x4   :  { %p274_p2 = pnand %p272_p1, %p269_p0 }
   0x6   :  { %277 = shalt.err (!%p274_p2)  }
   0x7   :  { %s376_s16 = smov [#allocation3]  }
   0x8   :  { %8 = dma.hbm_to_smem %s540_s0, 16, %s376_s16, [#allocation2] }
   0x9   :  { %350 = dma.done.wait [#allocation2], 16 }
   0xa   :  { %351 = vsyncadd [#allocation2], 4294967280 }
   0xb   :  { %10 = sfence }
   0xc   :  { %11 = vsyncpa [#allocation5], 0 }
   0xd   :  { %12 = vsyncpa [#allocation6], 0 }
   0xe   :  { %14 = vsyncpa [#allocation6 + $0x1], 0  ;;  %s408_s19 = smov 0   ;;  %s410_s20 = smov 0  }
   0xf   :  { %s412_s21 = smov 0   ;;  %s414_s22 = smov 0  }
  0x10 LB: > { %s429_s0 = sadd.s32 4294967295, %s374_s22   ;;  %s203_s23 = sadd.s32 4294967294, %s374_s22   ;;  %s374_s22 = sphi %s414_s22, %s558_s22   ;;  %s370_s21 = sphi %s412_s21, %s557_s21   ;;  %s366_s20 = sphi %s410_s20, %s556_s20   ;;  %s362_s19 = sphi %s408_s19, %s555_s19  }
  0x11   : > { %s433_s24 = sadd.s32 1, %s374_s22   ;;  %s48_s25 = sadd.s32 1, %s370_s21 }
  0x12   : > { %s45_s26 = ssub.s32 %s374_s22, %s433_s24  ;;  %p58_p3 = scmp.ne.s32.totalorder %s370_s21, %s366_s20 }
  0x13   : > { %p46_p4 = scmp.eq.s32.totalorder %s45_s26, 0  ;;  %p59_p5 = scmp.eq.s32.totalorder %s429_s0, 1 }
  0x14   : > { %p64_p6 = scmp.ne.s32.totalorder %s366_s20, %s362_s19  ;;  %p65_p7 = scmp.eq.s32.totalorder %s203_s23, 1 }
  0x15   : > { %s444_s27 = scalar_select %p46_p4, %s370_s21, %s48_s25  }
  0x16   : > { %p446_p8 = por %p59_p5, %p58_p3  ;;  %p450_p9 = por %p65_p7, %p64_p6 }
  0x17   : > { %p204_p10 = scmp.ge.s32.totalorder %s374_s22, 1  ;;  %p72_p11 = scmp.lt.s32.totalorder %s374_s22, 3 }
  0x18   : > { %s546_s28 = scalar_select %p446_p8, 1, 0 }
  0x19   : > { %s547_s29 = scalar_select %p450_p9, 1, 0 }
  0x1a   : > { %p543_p12 = scmp.eq.s32.totalorder %s429_s0, 0  ;;  %p457_p13 = pnand %p204_p10, %p72_p11 }
  0x1b   : > { %s377_s3 = smov [#allocation4]   ;;  %s278_s8 = scalar_lea.hbm %s541_s1, 256 }
  0x1c   : > { %s548_s30 = scalar_select %p457_p13, 1, 0 }
  0x1d   : > { %s84_s4 = sshll.u32 %s377_s3, 4  ;;  %p221_p0 = pneg %p457_p13  ;;  %s85_s4 = int_to_ptr.vmem [resolvable:$true] %s84_s4 }
  0x1e   : > { %p279_p2 = scmp.ne.s32.totalorder %s541_s1, %s278_s8  ;;  %p285_p6 = scmp.lt.u32.totalorder %s278_s8, %s541_s1 }
  0x1f   : > { %p465_p1 = pnand %p543_p12, %p221_p0 }
  0x21   : > { %p280_p3 = pneg %p465_p1 }
  0x23   : > { %p281_p4 = pnand %p280_p3, %p279_p2 }
  0x25   : > { %p282_p5 = pneg %p281_p4 }
  0x27   : > { %p287_p7 = pnand %p285_p6, %p282_p5 }
  0x29   : > { %290 = shalt.err (!%p287_p7)
}
  0x2a   : > { %s291_s13 = scalar_lea.vmem %s85_s4, 256  ;;  %p299_p12 = scmp.lt.s32.totalorder %s85_s4, %s85_s4 }
  0x2b   : > { %p292_p10 = scmp.ne.s32.totalorder %s85_s4, %s291_s13  ;;  %p300_p9 = scmp.lt.s32.totalorder %s291_s13, %s291_s13 }
  0x2d   : > { %p294_p11 = pnand %p292_p10, %p280_p3  ;;  %p301_p8 = por %p300_p9, %p299_p12 }
  0x2f   : > { %p295_p0 = pneg %p294_p11 }
  0x31   : > { %p302_p13 = pnand %p301_p8, %p295_p0 }
  0x33   : > { %305 = shalt.err (!%p302_p13)
}
  0x34   : > { %s378_s14 = smov 128   ;;  %s379_s15 = smov 8  }
  0x35   : > { %224 = dma.hbm_to_vmem [thread:$0]  (!%p465_p1), %s541_s1, 256, %s85_s4, [#allocation5], %s378_s14, %s378_s14, %s379_s15  }
  0x36   : > { %p550_p2 = scmp.ne.s32.totalorder %s548_s30, 0 }
  0x37   : > { %p551_p4 = scmp.eq.s32.totalorder (!%p550_p2), %s429_s0, 0 }
  0x38   : > { %100 = sbr.rel (%p550_p2) target bundleno = 93 (0x5d), region = 24 }
  0x3f   : > { %353 = dma.done.wait (%p551_p4), [#allocation5], 256   ;;  %p552_p3 = pmov %p551_p4 }
  0x40   : > { %s118_s18 = sld [smem:[#allocation3 + %s429_s0]]  ;;  %s209_s23 = sshll.u32 %s429_s0, 3 }
  0x41   : > { %355 = vsyncadd (%p552_p3), [#allocation5], 4294967040  ;;  %s112_s25 = sand.u32 1, %s366_s20   ;;  %s116_s5 = scalar_lea.vmem [#allocation4], %s209_s23 }
  0x42   : > { %s208_s26 = sshll.u32 %s112_s25, 3  ;;  %v117_v0 = vld [vmem:[%s116_s5] sm:$0xff]  ;;  %s212_s7 = sshll.u32 %s429_s0, 7 }
  0x43   : > { %s114_s4 = scalar_lea.vmem [#allocation7], %s208_s26  ;;  %s500_s10 = scalar_lea.hbm %s542_s2, %s212_s7 }
  0x44   : > { %s140_s6 = sshll.u32 %s114_s4, 4  ;;  %s127_s11 = scalar_lea.sflag [#allocation6], %s112_s25  ;;  %s495_s6 = int_to_ptr.vmem [resolvable:$true] %s140_s6 }
  0x45   : > { %s306_s12 = scalar_lea.vmem %s495_s6, 128  ;;  %p553_p9 = scmp.ne.s32.totalorder %s546_s28, 0 }
  0x46   : > { %s210_s3 = sshll.u32 %s118_s18, 3  ;;  %p307_p8 = scmp.ne.s32.totalorder %s495_s6, %s306_s12 }
  0x47   : > { %s120_s30 = scalar_lea.vmem [#allocation4], %s210_s3  ;;  %s380_s0 = smov [#allocation7]  }
  0x48   : > { %v121_v1 = vld [vmem:[%s120_s30] sm:$0xff]  ;;  %p308_p12 = pnand %p307_p8, %p553_p9  ;;  %s310_s13 = sshll.u32 %s380_s0, 4  ;;  %s311_s13 = int_to_ptr.vmem [resolvable:$false] %s310_s13 }
  0x49   : > { %v122_v2 = vsub.f32 %v121_v1, %v117_v0  ;;  %s312_s14 = scalar_lea.vmem %s311_s13, 256  ;;  %p313_p1 = scmp.lt.s32.totalorder %s495_s6, %s311_s13 }
  0x4a   : > { %p309_p13 = pneg %p308_p12  ;;  %p314_p5 = scmp.lt.s32.totalorder %s312_s14, %s306_s12 }
  0x4b   : > { %v123_v3 = vmul.f32 0.5, %v122_v2 }
  0x4c   : > { %p315_p6 = por %p314_p5, %p313_p1 }
  0x4d   : > { %v124_v4 = vadd.f32 %v123_v3, %v117_v0 }
  0x4e   : > { %p316_p7 = pnand %p315_p6, %p309_p13 }
  0x4f   : > { %125 = vst [vmem:[%s114_s4] sm:$0xff] %v124_v4 }
  0x50   : > { %319 = shalt.err (!%p316_p7)
}
  0x51   : > { %s320_s15 = scalar_lea.hbm %s500_s10, 128  ;;  %s324_s18 = scalar_lea.hbm %s542_s2, 256 }
  0x52   : > { %p321_p10 = scmp.ne.s32.totalorder %s500_s10, %s320_s15  ;;  %p325_p2 = scmp.lt.u32.totalorder %s500_s10, %s542_s2 }
  0x53   : > { %p326_p4 = scmp.lt.u32.totalorder %s324_s18, %s320_s15  ;;  %p328_p8 = scmp.lt.u32.totalorder %s320_s15, %s500_s10 }
  0x54   : > { %p322_p11 = pnand %p321_p10, %p553_p9 }
  0x55   : > { %p327_p3 = por %p326_p4, %p325_p2 }
  0x56   : > { %p323_p0 = pneg %p322_p11 }
  0x57   : > { %p329_p12 = por %p328_p8, %p327_p3 }
  0x59   : > { %p330_p13 = pnand %p329_p12, %p323_p0 }
  0x5b   : > { %333 = shalt.err (!%p330_p13)
}
  0x5c   : > { %219 = dma.vmem_to_hbm [thread:$0]  (%p553_p9), %s495_s6, 128, %s500_s10, %s127_s11  }
  0x5d PF: > { %p231_p1 = scmp.ge.s32.totalorder %s374_s22, 2  ;;  %s152_s26 = sand.u32 1, %s362_s19  }
  0x5e   : > { %p554_p5 = scmp.ne.s32.totalorder %s547_s29, 0  ;;  %s153_s3 = scalar_lea.sflag [#allocation6], %s152_s26 }
  0x60   : > { %p226_p6 = pnand %p231_p1, %p554_p5 }
  0x62   : > { %357 = dma.done.wait (!%p226_p6), %s153_s3, 128  }
  0x63   : > { %359 = vsyncadd (!%p226_p6), %s153_s3, 4294967168  ;;  %p17_p7 = scmp.ge.s32.totalorder %s433_s24, 4   ;;  %s555_s19 = smov %s366_s20 }
  0x64   : > { %s556_s20 = smov %s370_s21  ;;  %s557_s21 = smov %s444_s27 }
  0x65   : > { %s558_s22 = smov %s433_s24  ;;  %19 = sbr.rel (!%p17_p7) target bundleno = 16 (0x10), region = 63 }
  0x6c   :  { %158 = vsyncpa [#allocation5], 1 }
  0x6d   :  { %160 = vsyncpa [#allocation5 + $0x1], 1 }
  0x6e   :  { %161 = vsyncpa [#allocation6], 1 }
  0x6f   :  { %163 = vsyncpa [#allocation6 + $0x1], 1 }

</bundles_post_ra>
